<compile_context>
chip_gen: v7x
topology: tpu7x:2x2x1
jax: 0.10.0
libtpu: 0.0.40
codegen_flags: <defaults>
</compile_context>

<pallas_src>
import functools

import jax
import jax.numpy as jnp
from jax.experimental import pallas as pl
from jax.experimental.pallas import tpu as pltpu


def _round_up(x, m):
    return ((x + m - 1) // m) * m


def _kd_kernel(logits_ref, old_logits_ref, out_ref, *, inv_t):
    # [tm, C] tiles (C = full class extent); all math in f32 regardless of
    # the input dtype.
    x = logits_ref[...].astype(jnp.float32) * inv_t       # student logits / T
    y = old_logits_ref[...].astype(jnp.float32) * inv_t   # teacher logits / T

    # log-sum-exp of the student row.
    x_max = jnp.max(x, axis=-1, keepdims=True)
    x_shift = x - x_max
    lse = jnp.log(jnp.sum(jnp.exp(x_shift), axis=-1, keepdims=True))

    # Teacher softmax numerators.
    y_max = jnp.max(y, axis=-1, keepdims=True)
    y_exp = jnp.exp(y - y_max)
    s = jnp.sum(y_exp, axis=-1, keepdims=True)                 # [tm, 1]
    inner = jnp.sum(y_exp * x_shift, axis=-1, keepdims=True)   # [tm, 1]

    # per_row = sum_c p_c * (lse - x_shift_c) = lse - inner / s   (sum_c p_c = 1)
    out_ref[...] = lse - inner / s


def common_kd_loss(logits, old_logits, temperature, *, tm=None):
    assert logits.shape == old_logits.shape and logits.ndim == 2
    n_rows, n_cls = logits.shape
    inv_t = 1.0 / float(temperature)

    isz_a = jnp.dtype(logits.dtype).itemsize
    isz_b = jnp.dtype(old_logits.dtype).itemsize
    bytes_per_row = n_cls * (isz_a + isz_b)        # both inputs, one buffer

    # Packed-sublane row alignment for the narrower input dtype.
    row_align = {4: 8, 2: 16, 1: 32}.get(min(isz_a, isz_b), 8)

    # Generation-aware VMEM budget for the pipelined input buffers.
    try:
        vmem_cap = int(pltpu.get_tpu_info().vmem_capacity_bytes)
    except Exception:
        vmem_cap = 64 * 1024 * 1024                 # conservative (v7x per-TC)
    budget = min(int(vmem_cap * 0.7), 96 * 1024 * 1024)

    # Row tile sized from the actual dtype (2 inputs x 2 pipeline buffers).
    if tm is None:
        tm = budget // (2 * bytes_per_row)
    tm = max(row_align, (int(tm) // row_align) * row_align)
    tm = min(tm, 2048)

    if tm >= n_rows:
        if n_rows >= 2 * row_align:
            # Guarantee >=2 grid steps so the "parallel" row axis can shard
            # across both TensorCores on v7x.
            tm = _round_up((n_rows + 1) // 2, row_align)
        else:
            tm = n_rows          # full-extent single block (always legal)

    num_steps = pl.cdiv(n_rows, tm)

    # Deeper input buffering only when huge vocabs force tiny row tiles.
    n_buf = 2
    if tm <= 32 and num_steps >= 4 and 3 * tm * bytes_per_row <= budget:
        n_buf = 3

    in_block = (tm, n_cls)
    idx = lambda i: (i, 0)
    if n_buf == 2:
        in_specs = [pl.BlockSpec(in_block, idx), pl.BlockSpec(in_block, idx)]
    else:
        in_specs = [
            pl.BlockSpec(in_block, idx, pipeline_mode=pl.Buffered(n_buf)),
            pl.BlockSpec(in_block, idx, pipeline_mode=pl.Buffered(n_buf)),
        ]

    cost = pl.CostEstimate(
        flops=8 * n_rows * n_cls,
        transcendentals=2 * n_rows * n_cls,
        bytes_accessed=n_rows * bytes_per_row + n_rows * 4,
    )

    per_row = pl.pallas_call(
        functools.partial(_kd_kernel, inv_t=inv_t),
        out_shape=jax.ShapeDtypeStruct((n_rows, 1), jnp.float32),
        grid=(num_steps,),
        in_specs=in_specs,
        out_specs=pl.BlockSpec((tm, 1), idx),
        compiler_params=pltpu.CompilerParams(
            dimension_semantics=("parallel",),
            vmem_limit_bytes=int(min(budget + (8 << 20), vmem_cap)),
        ),
        cost_estimate=cost,
    )(logits, old_logits)

    # Tiny XLA reduction over the per-row losses -> scalar mean.
    return jnp.mean(per_row)


def _ref_common_kd(logits, old_logits, temperature):
    logits = logits.astype(jnp.float32)
    old_logits = old_logits.astype(jnp.float32)
    log_q = jax.nn.log_softmax(logits / temperature, axis=1)
    p = jax.nn.softmax(old_logits / temperature, axis=1)
    return jnp.mean(jnp.sum(-p * log_q, axis=1))


if __name__ == "__main__":
    key = jax.random.PRNGKey(0)
    k1, k2, k3, k4, k5, k6 = jax.random.split(key, 6)

    # Case 1: small f32 problem, single full-extent block, ragged class dim.
    T1 = 2.0
    logits1 = jax.random.normal(k1, (8, 32), dtype=jnp.float32)
    old1 = jax.random.normal(k2, (8, 32), dtype=jnp.float32)
    loss1 = jax.block_until_ready(common_kd_loss(logits1, old1, T1))
    ref1 = jax.block_until_ready(_ref_common_kd(logits1, old1, T1))
    assert jnp.allclose(loss1, ref1, atol=1e-3, rtol=1e-3), (loss1, ref1)

    # Case 2: bf16 inputs, ragged rows + ragged classes, auto-sized grid with
    # a partial last row block (no padding anywhere).
    T2 = 3.0
    logits2 = jax.random.normal(k3, (300, 40), dtype=jnp.bfloat16)
    old2 = jax.random.normal(k4, (300, 40), dtype=jnp.bfloat16)
    loss2 = jax.block_until_ready(common_kd_loss(logits2, old2, T2))
    ref2 = jax.block_until_ready(_ref_common_kd(logits2, old2, T2))
    assert jnp.allclose(loss2, ref2, atol=1e-3, rtol=1e-3), (loss2, ref2)

    # Case 3: explicit row tile, ragged class dim > 128, multi-step grid.
    T3 = 4.0
    logits3 = jax.random.normal(k5, (100, 257), dtype=jnp.float32)
    old3 = jax.random.normal(k6, (100, 257), dtype=jnp.float32)
    loss3 = jax.block_until_ready(common_kd_loss(logits3, old3, T3, tm=64))
    ref3 = jax.block_until_ready(_ref_common_kd(logits3, old3, T3))
    assert jnp.allclose(loss3, ref3, atol=1e-3, rtol=1e-3), (loss3, ref3)

    print("KERNEL_OK")
</pallas_src>

<mosaic_0001>
module attributes {stable_mosaic.version = 11 : i64} {
  func.func @_kd_kernel(%arg0: i32, %arg1: memref<8x32xf32, #tpu.memory_space<vmem>>, %arg2: memref<8x32xf32, #tpu.memory_space<vmem>>, %arg3: memref<8x1xf32, #tpu.memory_space<vmem>>) attributes {dimension_semantics = [#tpu.dimension_semantics<parallel>], iteration_bounds = array<i64: 1>, scalar_prefetch = 0 : i64, scratch_operands = 0 : i64, tpu.core_type = #tpu.core_type<tc>, window_params = [{transform_indices = @transform_0, window_bounds = array<i64: 8, 32>}, {transform_indices = @transform_1, window_bounds = array<i64: 8, 32>}, {transform_indices = @transform_2, window_bounds = array<i64: 8, 1>}]} {
    %c0 = arith.constant 0 : index
    %c0_0 = arith.constant 0 : index
    %0 = vector.load %arg1[%c0, %c0_0] : memref<8x32xf32, #tpu.memory_space<vmem>>, vector<8x32xf32>
    %cst = arith.constant 5.000000e-01 : f32
    %1 = vector.broadcast %cst : f32 to vector<8x32xf32>
    %2 = arith.mulf %0, %1 : vector<8x32xf32>
    %c0_1 = arith.constant 0 : index
    %c0_2 = arith.constant 0 : index
    %3 = vector.load %arg2[%c0_1, %c0_2] : memref<8x32xf32, #tpu.memory_space<vmem>>, vector<8x32xf32>
    %cst_3 = arith.constant 5.000000e-01 : f32
    %4 = vector.broadcast %cst_3 : f32 to vector<8x32xf32>
    %5 = arith.mulf %3, %4 : vector<8x32xf32>
    %cst_4 = arith.constant dense<0xFF800000> : vector<8xf32>
    %6 = vector.multi_reduction <maximumf>, %2, %cst_4 [1] : vector<8x32xf32> to vector<8xf32>
    %7 = vector.shape_cast %6 : vector<8xf32> to vector<8x1xf32>
    %8 = vector.broadcast %7 : vector<8x1xf32> to vector<8x32xf32>
    %9 = arith.subf %2, %8 : vector<8x32xf32>
    %10 = math.exp %9 : vector<8x32xf32>
    %cst_5 = arith.constant dense<0.000000e+00> : vector<8xf32>
    %11 = vector.multi_reduction <add>, %10, %cst_5 [1] : vector<8x32xf32> to vector<8xf32>
    %12 = vector.shape_cast %11 : vector<8xf32> to vector<8x1xf32>
    %13 = math.log %12 : vector<8x1xf32>
    %cst_6 = arith.constant dense<0xFF800000> : vector<8xf32>
    %14 = vector.multi_reduction <maximumf>, %5, %cst_6 [1] : vector<8x32xf32> to vector<8xf32>
    %15 = vector.shape_cast %14 : vector<8xf32> to vector<8x1xf32>
    %16 = vector.broadcast %15 : vector<8x1xf32> to vector<8x32xf32>
    %17 = arith.subf %5, %16 : vector<8x32xf32>
    %18 = math.exp %17 : vector<8x32xf32>
    %cst_7 = arith.constant dense<0.000000e+00> : vector<8xf32>
    %19 = vector.multi_reduction <add>, %18, %cst_7 [1] : vector<8x32xf32> to vector<8xf32>
    %20 = vector.shape_cast %19 : vector<8xf32> to vector<8x1xf32>
    %21 = arith.mulf %18, %9 : vector<8x32xf32>
    %cst_8 = arith.constant dense<0.000000e+00> : vector<8xf32>
    %22 = vector.multi_reduction <add>, %21, %cst_8 [1] : vector<8x32xf32> to vector<8xf32>
    %23 = vector.shape_cast %22 : vector<8xf32> to vector<8x1xf32>
    %24 = arith.divf %23, %20 : vector<8x1xf32>
    %25 = arith.subf %13, %24 : vector<8x1xf32>
    %c0_9 = arith.constant 0 : index
    %c0_10 = arith.constant 0 : index
    %26 = vector.load %arg3[%c0_9, %c0_10] : memref<8x1xf32, #tpu.memory_space<vmem>>, vector<8x1xf32>
    tpu.vector_store %arg3[%c0_9, %c0_10], %25 {strides = array<i32>} : memref<8x1xf32, #tpu.memory_space<vmem>>, vector<8x1xf32>,
    return
  }
  func.func @transform_0(%arg0: i32) -> (i32, i32) {
    %c0_i32 = arith.constant 0 : i32
    %c0_i32_0 = arith.constant 0 : i32
    return %arg0, %c0_i32 : i32, i32
  }
  func.func @transform_1(%arg0: i32) -> (i32, i32) {
    %c0_i32 = arith.constant 0 : i32
    %c0_i32_0 = arith.constant 0 : i32
    return %arg0, %c0_i32 : i32, i32
  }
  func.func @transform_2(%arg0: i32) -> (i32, i32) {
    %c0_i32 = arith.constant 0 : i32
    %c0_i32_0 = arith.constant 0 : i32
    return %arg0, %c0_i32 : i32, i32
  }
}

</mosaic_0001>

<bundles_post_ra>
// kernel: tpu_custom_call.1
= control target key start
LH: loop header
LB: loop body
LE: loop exit
PB: predicated region body
PF: predicated region fallthrough
CT: control target
= control target key end

     0   :  { %7 = vsyncpa [#allocation3], 0  ;;  %s182_s0 = inlined_call_operand.hbm [shape: f32[8,32], index: 0, kind: input, shape index: {}]   ;;  %s183_s1 = inlined_call_operand.hbm [shape: f32[8,32], index: 1, kind: input, shape index: {}]   ;;  %s184_s2 = inlined_call_operand.vmem [shape: f32[8,1], index: 2, kind: output, shape index: {}]  }
   0x1   :  { %8 = vsyncpa [#allocation5], 0  ;;  %s133_s9 = smov [#allocation2]   ;;  %s134_s11 = smov [#allocation4]  }
   0x2   :  { %s15_s10 = sshll.u32 %s133_s9, 4  ;;  %s25_s12 = sshll.u32 %s134_s11, 4  ;;  %s16_s10 = int_to_ptr.vmem [resolvable:$true] %s15_s10  ;;  %s26_s12 = int_to_ptr.vmem [resolvable:$true] %s25_s12 }
   0x3   :  { %s85_s15 = scalar_lea.hbm %s182_s0, 128 }
   0x4   :  { %p86_p0 = scmp.ne.s32.totalorder %s182_s0, %s85_s15  ;;  %p89_p1 = scmp.lt.u32.totalorder %s85_s15, %s182_s0 }
   0x6   :  { %p91_p2 = pnand %p89_p1, %p86_p0 }
   0x8   :  { %94 = shalt.err (!%p91_p2)
}
   0x9   :  { %s95_s20 = scalar_lea.vmem %s16_s10, 128  ;;  %p100_p4 = scmp.lt.s32.totalorder %s16_s10, %s16_s10 }
   0xa   :  { %p96_p3 = scmp.ne.s32.totalorder %s16_s10, %s95_s20  ;;  %p101_p5 = scmp.lt.s32.totalorder %s95_s20, %s95_s20 }
   0xc   :  { %p102_p6 = por %p101_p5, %p100_p4 }
   0xe   :  { %p103_p7 = pnand %p102_p6, %p96_p3 }
  0x10   :  { %106 = shalt.err (!%p103_p7)
}
  0x11   :  { %18 = dma.hbm_to_vmem [thread:$0]  %s182_s0, 128, %s16_s10, [#allocation3]  }
  0x12   :  { %s107_s25 = scalar_lea.hbm %s183_s1, 128 }
  0x13   :  { %p108_p8 = scmp.ne.s32.totalorder %s183_s1, %s107_s25  ;;  %p111_p9 = scmp.lt.u32.totalorder %s107_s25, %s183_s1 }
  0x15   :  { %p113_p10 = pnand %p111_p9, %p108_p8 }
  0x17   :  { %116 = shalt.err (!%p113_p10)
}
  0x18   :  { %s117_s30 = scalar_lea.vmem %s26_s12, 128  ;;  %p122_p12 = scmp.lt.s32.totalorder %s26_s12, %s26_s12 }
  0x19   :  { %p118_p11 = scmp.ne.s32.totalorder %s26_s12, %s117_s30  ;;  %p123_p13 = scmp.lt.s32.totalorder %s117_s30, %s117_s30 }
  0x1b   :  { %p124_p0 = por %p123_p13, %p122_p12 }
  0x1d   :  { %p125_p1 = pnand %p124_p0, %p118_p11 }
  0x1f   :  { %128 = shalt.err (!%p125_p1)
}
  0x20   :  { %28 = dma.hbm_to_vmem [thread:$0]  %s183_s1, 128, %s26_s12, [#allocation5]  }
  0x21   :  { %129 = dma.done.wait [#allocation3], 128  }
  0x22   :  { %130 = vsyncadd [#allocation3], 4294967168 }
  0x23   :  { %131 = dma.done.wait [#allocation5], 128  }
  0x24   :  { %132 = vsyncadd [#allocation5], 4294967168  ;;  %v35_v0 = vld [vmem:[#allocation2] sm:$0xff]  ;;  %vm39_vm0 = vcmask 261120   ;;  %v37_v1 = vld [vmem:[#allocation4] sm:$0xff]  ;;  %vm67_vm1 = vcmask 7168  }
  0x25   :  { %v36_v2 = vmul.f32 0.5, %v35_v0  ;;  %v38_v3 = vmul.f32 0.5, %v37_v1 }
  0x27   :  { %v40_v4 = vsel %vm39_vm0, %v36_v2, -inf  ;;  %v51_v5 = vsel %vm39_vm0, %v38_v3, -inf }
  0x28   :  { %41 = vmax.xlane.f32.xlu0 %v40_v4 }
  0x2c   :  { %52 = vmax.xlane.f32.xlu0 %v51_v5 }
  0xb5   :  { %v42_v6 = vpop.xlane.xlu0 %41 }
  0xb6   :  { %v43_v7 = vsub.f32 %v36_v2, %v42_v6 }
  0xb8   :  { %v44_v8 = vmul.f32 1.442695, %v43_v7 }
  0xb9   :  { %v53_v9 = vpop.xlane.xlu0 %52 }
  0xba   :  { %77 = vpow2.f32 %v44_v8  ;;  %v54_v10 = vsub.f32 %v38_v3, %v53_v9 }
  0xbc   :  { %v55_v11 = vmul.f32 1.442695, %v54_v10 }
  0xbe   :  { %79 = vpow2.f32 %v55_v11 }
  0xc4   :  { %v78_v12 = vpop.eup %77 }
  0xc5   :  { %v46_v13 = vsel %vm39_vm0, %v78_v12, 0.0 }
  0xc6   :  { %47 = vadd.xlane.f32.xlu1 %v46_v13 }
  0xc8   :  { %v80_v14 = vpop.eup %79 }
  0xc9   :  { %v57_v15 = vsel %vm39_vm0, %v80_v14, 0.0  ;;  %v60_v16 = vmul.f32 %v80_v14, %v43_v7 }
  0xca   :  { %58 = vadd.xlane.f32.xlu1 %v57_v15 }
  0xcb   :  { %v61_v17 = vsel %vm39_vm0, %v60_v16, 0.0 }
  0xcc   :  { %62 = vadd.xlane.f32.xlu0 %v61_v17 }
 0x153   :  { %v48_v18 = vpop.xlane.xlu1 %47 }
 0x154   :  { %81 = vlog2.f32 %v48_v18 }
 0x157   :  { %v59_v19 = vpop.xlane.xlu1 %58 }
 0x158   :  { %83 = vrcp.f32 %v59_v19 }
 0x159   :  { %v63_v22 = vpop.xlane.xlu0 %62 }
 0x15e   :  { %v82_v20 = vpop.eup %81 }
 0x15f   :  { %v50_v23 = vmul.f32 0.6931472, %v82_v20 }
 0x162   :  { %v84_v21 = vpop.eup %83 }
 0x163   :  { %v65_v24 = vmul.f32 %v84_v21, %v63_v22 }
 0x165   :  { %v66_v25 = vsub.f32 %v50_v23, %v65_v24 }
 0x167   :  { %68 = vst.msk [vmem:[%s184_s2] sm:$0xff] %vm67_vm1, %v66_v25 }
 0x168   :  { %73 = vsyncpa [#allocation3], 1 }
 0x169   :  { %74 = vsyncpa [#allocation5], 1 }

</bundles_post_ra>
